<compile_context>
chip_gen: v7x
topology: tpu7x:2x2x1
jax: 0.10.0
libtpu: 0.0.40
codegen_flags: <defaults>
</compile_context>

<pallas_src>
import math
from functools import partial

import jax
import jax.numpy as jnp
from jax.experimental import pallas as pl
from jax.experimental.pallas import tpu as pltpu

LANE = 128        # TPU lane width (last-dim tile)
SUBLANE = 8       # TPU sublane width (second-to-last-dim tile)
TILE_B_MAX = 512  # max batch tile for the gridded path (sweep 256-1024)
SMALL_BATCH = 128 # <= this -> grid-less whole-VMEM path


class Config:
    input_size = 32
    hidden_sizes = [64, 64]
    output_size = 16
    output_activation = "tanh"   # mirrors config.output_activation (torch.tanh)


def _round_up(x, m):
    return (x + m - 1) // m * m


# -----------------------------------------------------------------------------
# Parameter init mirroring Network.__init__/reset_parameters.
# Layer structure (matches the PyTorch module exactly; for hidden_sizes=[64,64]
# this is 4 Linear layers: 32->64, 64->64, 64->64, 64->16):
#   input:  Linear(input_size, hidden_sizes[0])
#   hidden: Linear(h_i, h_{i+1})  (last hidden is h_last -> h_last)
#   output: Linear(hidden_sizes[-1], output_size)
# Weights: hidden/input ~ U(+-1/sqrt(fan_in)) (hidden_init); output ~ U(+-0.003).
# Biases keep PyTorch's default Linear init U(+-1/sqrt(fan_in)).
# -----------------------------------------------------------------------------
def init_params(key, config):
    layer_dims = [(config.input_size, config.hidden_sizes[0])]
    for i in range(len(config.hidden_sizes)):
        out_size = (config.hidden_sizes[i]
                    if i + 1 == len(config.hidden_sizes)
                    else config.hidden_sizes[i + 1])
        layer_dims.append((config.hidden_sizes[i], out_size))
    layer_dims.append((config.hidden_sizes[-1], config.output_size))

    params = []
    n_layers = len(layer_dims)
    keys = jax.random.split(key, 2 * n_layers)
    for idx, (fan_in, fan_out) in enumerate(layer_dims):
        wk, bk = keys[2 * idx], keys[2 * idx + 1]
        w_lim = 0.003 if idx == n_layers - 1 else 1.0 / math.sqrt(fan_in)
        b_lim = 1.0 / math.sqrt(fan_in)
        w = jax.random.uniform(wk, (fan_in, fan_out), jnp.float32, -w_lim, w_lim)
        b = jax.random.uniform(bk, (fan_out,), jnp.float32, -b_lim, b_lim)
        params.append((w, b))
    return params


# -----------------------------------------------------------------------------
# One-time parameter packing: zero-pad every layer to a common lane-dense
# width P (multiple of 128) and stack into single slabs.  Done once at init /
# load time, NOT per forward call.
# -----------------------------------------------------------------------------
def pack_params(params):
    dims = [params[0][0].shape[0]] + [w.shape[1] for (w, _) in params]
    pad = _round_up(max(dims), LANE)
    n_layers = len(params)
    w_packed = jnp.zeros((n_layers, pad, pad), jnp.bfloat16)
    b_packed = jnp.zeros((n_layers, 1, pad), jnp.float32)
    for i, (w, b) in enumerate(params):
        fi, fo = w.shape
        w_packed = w_packed.at[i, :fi, :fo].set(w.astype(jnp.bfloat16))
        b_packed = b_packed.at[i, 0, :fo].set(b)
    return w_packed, b_packed, dims


# -----------------------------------------------------------------------------
# Pallas kernel: fused MLP forward on one batch tile.
#   x_ref : bf16 [tile_b, in_dim]   (narrow input, no lane padding)
#   w_ref : bf16 [L, P, P]          (all layers, resident in VMEM)
#   b_ref : f32  [L, 1, P]
#   o_ref : f32  [tile_b, out_dim]  (narrow output; only real lanes written)
# -----------------------------------------------------------------------------
def _mlp_kernel(x_ref, w_ref, b_ref, o_ref, *, n_layers, in_dim, out_dim,
                output_activation):
    h = x_ref[...]                                            # bf16 [tb, in_dim]

    # Layer 0: contract only the real in_dim rows of the padded weight tile.
    w0 = w_ref[0][:in_dim, :]                                 # bf16 [in_dim, P]
    h = jnp.dot(h, w0, preferred_element_type=jnp.float32) + b_ref[0]
    if n_layers > 1:
        h = jnp.maximum(h, 0.0)                               # ReLU (VPU, f32)

    # Remaining layers: full padded K (zero-padded rows/cols contribute 0).
    for i in range(1, n_layers):                              # unrolled at trace time
        h = jnp.dot(h.astype(jnp.bfloat16), w_ref[i],
                    preferred_element_type=jnp.float32) + b_ref[i]
        if i < n_layers - 1:
            h = jnp.maximum(h, 0.0)

    # Activation + cast only on the real output lanes (8x fewer EUP pushes).
    out = h[:, :out_dim]
    if output_activation == "tanh":
        out = jnp.tanh(out)                                   # EUP, f32
    elif output_activation == "sigmoid":
        out = jax.nn.sigmoid(out)
    # output_activation is None -> identity
    o_ref[...] = out.astype(o_ref.dtype)


def _vmem_spec():
    return pl.BlockSpec(memory_space=pltpu.MemorySpace.VMEM)


def _pick_tile_b(batch):
    # Tiles big enough to amortize the ~0.35 us/step grid overhead, but always
    # >= 2 grid steps so the "parallel" axis can shard across v7x's 2 TCs.
    half = _round_up((batch + 1) // 2, SUBLANE)
    return max(SUBLANE, min(TILE_B_MAX, half))


def mlp_forward(x, w_packed, b_packed, dims, output_activation):
    """Whole MLP forward in one Pallas TPU kernel call."""
    n_layers, pad, _ = w_packed.shape
    in_dim, out_dim = dims[0], dims[-1]
    batch = x.shape[0]

    # bf16 input halves the kernel's input DMA and matches the MXU operand
    # dtype (f32 accumulation inside the kernel).
    x_bf16 = x.astype(jnp.bfloat16)

    kernel = partial(_mlp_kernel, n_layers=n_layers, in_dim=in_dim,
                     out_dim=out_dim, output_activation=output_activation)

    if batch <= SMALL_BATCH:
        # Grid-less call: whole arrays live in VMEM, no per-step grid overhead.
        return pl.pallas_call(
            kernel,
            out_shape=jax.ShapeDtypeStruct((batch, out_dim), jnp.float32),
            in_specs=[_vmem_spec(), _vmem_spec(), _vmem_spec()],
            out_specs=_vmem_spec(),
        )(x_bf16, w_packed, b_packed)

    # Batch-tiled path: big M tiles, weights/biases resident (single DMA, no
    # double buffer), "parallel" axis -> sharded across v7x's 2 TensorCores.
    tile_b = _pick_tile_b(batch)
    grid = pl.cdiv(batch, tile_b)
    return pl.pallas_call(
        kernel,
        out_shape=jax.ShapeDtypeStruct((batch, out_dim), jnp.float32),
        grid=(grid,),
        in_specs=[
            pl.BlockSpec((tile_b, in_dim), lambda i: (i, 0)),
            _vmem_spec(),   # whole weight slab resident across the grid
            _vmem_spec(),   # whole bias slab resident across the grid
        ],
        out_specs=pl.BlockSpec((tile_b, out_dim), lambda i: (i, 0)),
        compiler_params=pltpu.CompilerParams(
            dimension_semantics=("parallel",)),
    )(x_bf16, w_packed, b_packed)


# -----------------------------------------------------------------------------
# Pure-JAX reference (same bf16-operand / f32-accumulate numerics).
# -----------------------------------------------------------------------------
def mlp_reference(x, params, output_activation):
    h = x.astype(jnp.bfloat16)
    n = len(params)
    for i, (w, b) in enumerate(params):
        h = jnp.dot(h, w.astype(jnp.bfloat16),
                    preferred_element_type=jnp.float32) + b
        if i < n - 1:
            h = jnp.maximum(h, 0.0).astype(jnp.bfloat16)
    if output_activation == "tanh":
        h = jnp.tanh(h)
    elif output_activation == "sigmoid":
        h = jax.nn.sigmoid(h)
    return h


if __name__ == "__main__":
    config = Config()
    key = jax.random.PRNGKey(0)
    pkey, xkey, xkey2 = jax.random.split(key, 3)

    params = init_params(pkey, config)
    w_packed, b_packed, dims = pack_params(params)   # packed once, reused

    # Small batch -> grid-less full-VMEM path.
    batch = 8
    x = jax.random.normal(xkey, (batch, config.input_size), jnp.float32)
    out = jax.block_until_ready(
        mlp_forward(x, w_packed, b_packed, dims, config.output_activation))
    ref = mlp_reference(x, params, config.output_activation)
    assert out.shape == (batch, config.output_size)
    assert jnp.allclose(out, ref, atol=1e-3, rtol=1e-3), "small-batch mismatch"

    # Larger, non-multiple-of-tile batch -> tiled "parallel" grid path with a
    # masked partial edge block (no host-side padding).
    big_batch = 300
    xb = jax.random.normal(xkey2, (big_batch, config.input_size), jnp.float32)
    out_b = jax.block_until_ready(
        mlp_forward(xb, w_packed, b_packed, dims, config.output_activation))
    ref_b = mlp_reference(xb, params, config.output_activation)
    assert out_b.shape == (big_batch, config.output_size)
    assert jnp.allclose(out_b, ref_b, atol=1e-3, rtol=1e-3), "batched mismatch"

    print("KERNEL_OK")
</pallas_src>

<mosaic_0001>
module attributes {stable_mosaic.version = 11 : i64} {
  func.func @_mlp_kernel(%arg0: memref<8x32xbf16, #tpu.memory_space<vmem>>, %arg1: memref<4x128x128xbf16, #tpu.memory_space<vmem>>, %arg2: memref<4x1x128xf32, #tpu.memory_space<vmem>>, %arg3: memref<8x16xf32, #tpu.memory_space<vmem>>) attributes {dimension_semantics = [], scalar_prefetch = 0 : i64, scratch_operands = 0 : i64, tpu.core_type = #tpu.core_type<tc>} {
    %c0 = arith.constant 0 : index
    %c0_0 = arith.constant 0 : index
    %0 = vector.load %arg0[%c0, %c0_0] : memref<8x32xbf16, #tpu.memory_space<vmem>>, vector<8x32xbf16>
    %c0_1 = arith.constant 0 : index
    %c0_2 = arith.constant 0 : index
    %c0_3 = arith.constant 0 : index
    %1 = vector.load %arg1[%c0_1, %c0_2, %c0_3] : memref<4x128x128xbf16, #tpu.memory_space<vmem>>, vector<1x128x128xbf16>
    %2 = vector.shape_cast %1 : vector<1x128x128xbf16> to vector<128x128xbf16>
    %3 = vector.extract_strided_slice %2 {offsets = [0, 0], sizes = [32, 128], strides = [1, 1]} : vector<128x128xbf16> to vector<32x128xbf16>
    %cst = arith.constant dense<0.000000e+00> : vector<8x128xf32>
    %4 = tpu.matmul %0, %3, %cst {dimension_numbers = #tpu.dot_dimension_numbers<[1], [0], [0], [1], [0, 0, 1, 1], [], []>} : vector<8x32xbf16>, vector<32x128xbf16>, vector<8x128xf32> -> vector<8x128xf32>
    %c0_4 = arith.constant 0 : index
    %c0_5 = arith.constant 0 : index
    %c0_6 = arith.constant 0 : index
    %5 = vector.load %arg2[%c0_4, %c0_5, %c0_6] : memref<4x1x128xf32, #tpu.memory_space<vmem>>, vector<1x1x128xf32>
    %6 = vector.shape_cast %5 : vector<1x1x128xf32> to vector<1x128xf32>
    %7 = vector.broadcast %6 : vector<1x128xf32> to vector<8x128xf32>
    %8 = arith.addf %4, %7 : vector<8x128xf32>
    %cst_7 = arith.constant 0.000000e+00 : f32
    %9 = vector.broadcast %cst_7 : f32 to vector<8x128xf32>
    %10 = arith.maximumf %8, %9 : vector<8x128xf32>
    %11 = arith.truncf %10 : vector<8x128xf32> to vector<8x128xbf16>
    %c1 = arith.constant 1 : index
    %c0_8 = arith.constant 0 : index
    %c0_9 = arith.constant 0 : index
    %12 = vector.load %arg1[%c1, %c0_8, %c0_9] : memref<4x128x128xbf16, #tpu.memory_space<vmem>>, vector<1x128x128xbf16>
    %13 = vector.shape_cast %12 : vector<1x128x128xbf16> to vector<128x128xbf16>
    %cst_10 = arith.constant dense<0.000000e+00> : vector<8x128xf32>
    %14 = tpu.matmul %11, %13, %cst_10 {dimension_numbers = #tpu.dot_dimension_numbers<[1], [0], [0], [1], [0, 0, 1, 1], [], []>} : vector<8x128xbf16>, vector<128x128xbf16>, vector<8x128xf32> -> vector<8x128xf32>
    %c1_11 = arith.constant 1 : index
    %c0_12 = arith.constant 0 : index
    %c0_13 = arith.constant 0 : index
    %15 = vector.load %arg2[%c1_11, %c0_12, %c0_13] : memref<4x1x128xf32, #tpu.memory_space<vmem>>, vector<1x1x128xf32>
    %16 = vector.shape_cast %15 : vector<1x1x128xf32> to vector<1x128xf32>
    %17 = vector.broadcast %16 : vector<1x128xf32> to vector<8x128xf32>
    %18 = arith.addf %14, %17 : vector<8x128xf32>
    %cst_14 = arith.constant 0.000000e+00 : f32
    %19 = vector.broadcast %cst_14 : f32 to vector<8x128xf32>
    %20 = arith.maximumf %18, %19 : vector<8x128xf32>
    %21 = arith.truncf %20 : vector<8x128xf32> to vector<8x128xbf16>
    %c2 = arith.constant 2 : index
    %c0_15 = arith.constant 0 : index
    %c0_16 = arith.constant 0 : index
    %22 = vector.load %arg1[%c2, %c0_15, %c0_16] : memref<4x128x128xbf16, #tpu.memory_space<vmem>>, vector<1x128x128xbf16>
    %23 = vector.shape_cast %22 : vector<1x128x128xbf16> to vector<128x128xbf16>
    %cst_17 = arith.constant dense<0.000000e+00> : vector<8x128xf32>
    %24 = tpu.matmul %21, %23, %cst_17 {dimension_numbers = #tpu.dot_dimension_numbers<[1], [0], [0], [1], [0, 0, 1, 1], [], []>} : vector<8x128xbf16>, vector<128x128xbf16>, vector<8x128xf32> -> vector<8x128xf32>
    %c2_18 = arith.constant 2 : index
    %c0_19 = arith.constant 0 : index
    %c0_20 = arith.constant 0 : index
    %25 = vector.load %arg2[%c2_18, %c0_19, %c0_20] : memref<4x1x128xf32, #tpu.memory_space<vmem>>, vector<1x1x128xf32>
    %26 = vector.shape_cast %25 : vector<1x1x128xf32> to vector<1x128xf32>
    %27 = vector.broadcast %26 : vector<1x128xf32> to vector<8x128xf32>
    %28 = arith.addf %24, %27 : vector<8x128xf32>
    %cst_21 = arith.constant 0.000000e+00 : f32
    %29 = vector.broadcast %cst_21 : f32 to vector<8x128xf32>
    %30 = arith.maximumf %28, %29 : vector<8x128xf32>
    %31 = arith.truncf %30 : vector<8x128xf32> to vector<8x128xbf16>
    %c3 = arith.constant 3 : index
    %c0_22 = arith.constant 0 : index
    %c0_23 = arith.constant 0 : index
    %32 = vector.load %arg1[%c3, %c0_22, %c0_23] : memref<4x128x128xbf16, #tpu.memory_space<vmem>>, vector<1x128x128xbf16>
    %33 = vector.shape_cast %32 : vector<1x128x128xbf16> to vector<128x128xbf16>
    %cst_24 = arith.constant dense<0.000000e+00> : vector<8x128xf32>
    %34 = tpu.matmul %31, %33, %cst_24 {dimension_numbers = #tpu.dot_dimension_numbers<[1], [0], [0], [1], [0, 0, 1, 1], [], []>} : vector<8x128xbf16>, vector<128x128xbf16>, vector<8x128xf32> -> vector<8x128xf32>
    %c3_25 = arith.constant 3 : index
    %c0_26 = arith.constant 0 : index
    %c0_27 = arith.constant 0 : index
    %35 = vector.load %arg2[%c3_25, %c0_26, %c0_27] : memref<4x1x128xf32, #tpu.memory_space<vmem>>, vector<1x1x128xf32>
    %36 = vector.shape_cast %35 : vector<1x1x128xf32> to vector<1x128xf32>
    %37 = vector.broadcast %36 : vector<1x128xf32> to vector<8x128xf32>
    %38 = arith.addf %34, %37 : vector<8x128xf32>
    %39 = vector.extract_strided_slice %38 {offsets = [0, 0], sizes = [8, 16], strides = [1, 1]} : vector<8x128xf32> to vector<8x16xf32>
    %40 = math.tanh %39 : vector<8x16xf32>
    %c0_28 = arith.constant 0 : index
    %c0_29 = arith.constant 0 : index
    %41 = vector.load %arg3[%c0_28, %c0_29] : memref<8x16xf32, #tpu.memory_space<vmem>>, vector<8x16xf32>
    tpu.vector_store %arg3[%c0_28, %c0_29], %40 {strides = array<i32>} : memref<8x16xf32, #tpu.memory_space<vmem>>, vector<8x16xf32>,
    return
  }
}

</mosaic_0001>

<bundles_post_ra>
// kernel: tpu_custom_call.1
= control target key start
LH: loop header
LB: loop body
LE: loop exit
PB: predicated region body
PF: predicated region fallthrough
CT: control target
= control target key end

     0   :  { %8 = vsyncpa [#allocation3], 0  ;;  %s829_s0 = inlined_call_operand.hbm [shape: bf16[8,32], index: 0, kind: input, shape index: {}]   ;;  %s830_s1 = inlined_call_operand.hbm [shape: bf16[4,128,128], index: 1, kind: input, shape index: {}]   ;;  %s831_s2 = inlined_call_operand.vmem [shape: f32[4,1,128], index: 2, kind: input, shape index: {}]   ;;  %s832_s3 = inlined_call_operand.hbm [shape: f32[8,16], index: 3, kind: output, shape index: {}]  }
   0x1   :  { %9 = vsyncpa [#allocation6], 0 }
   0x2   :  { %10 = vsyncpa [#allocation4], 0  ;;  %s713_s12 = smov [#allocation2]   ;;  %s714_s14 = smov [#allocation5]  }
   0x3   :  { %s17_s13 = sshll.u32 %s713_s12, 4  ;;  %s26_s15 = sshll.u32 %s714_s14, 4  ;;  %s18_s13 = int_to_ptr.vmem [resolvable:$true] %s17_s13  ;;  %s740_s15 = int_to_ptr.vmem [resolvable:$true] %s26_s15 }
   0x4   :  { %s641_s18 = scalar_lea.hbm %s829_s0, 64 }
   0x5   :  { %p642_p0 = scmp.ne.s32.totalorder %s829_s0, %s641_s18  ;;  %p645_p1 = scmp.lt.u32.totalorder %s641_s18, %s829_s0 }
   0x7   :  { %p647_p2 = pnand %p645_p1, %p642_p0 }
   0x9   :  { %650 = shalt.err (!%p647_p2)
}
   0xa   :  { %s651_s23 = scalar_lea.vmem %s18_s13, 64  ;;  %p656_p4 = scmp.lt.s32.totalorder %s18_s13, %s18_s13 }
   0xb   :  { %p652_p3 = scmp.ne.s32.totalorder %s18_s13, %s651_s23  ;;  %p657_p5 = scmp.lt.s32.totalorder %s651_s23, %s651_s23 }
   0xd   :  { %p658_p6 = por %p657_p5, %p656_p4 }
   0xf   :  { %p659_p7 = pnand %p658_p6, %p652_p3 }
  0x11   :  { %662 = shalt.err (!%p659_p7)
}
  0x12   :  { %20 = dma.hbm_to_vmem [thread:$0]  %s829_s0, 64, %s18_s13, [#allocation3]  }
  0x13   :  { %s663_s28 = scalar_lea.hbm %s830_s1, 4096 }
  0x14   :  { %p664_p8 = scmp.ne.s32.totalorder %s830_s1, %s663_s28  ;;  %p667_p9 = scmp.lt.u32.totalorder %s663_s28, %s830_s1 }
  0x16   :  { %p669_p10 = pnand %p667_p9, %p664_p8 }
  0x18   :  { %672 = shalt.err (!%p669_p10)
}
  0x19   :  { %s673_s6 = scalar_lea.vmem %s740_s15, 4096  ;;  %p678_p12 = scmp.lt.s32.totalorder %s740_s15, %s740_s15 }
  0x1a   :  { %p674_p11 = scmp.ne.s32.totalorder %s740_s15, %s673_s6  ;;  %p679_p13 = scmp.lt.s32.totalorder %s673_s6, %s673_s6 }
  0x1c   :  { %p680_p0 = por %p679_p13, %p678_p12 }
  0x1e   :  { %p681_p1 = pnand %p680_p0, %p674_p11 }
  0x20   :  { %684 = shalt.err (!%p681_p1)
}
  0x21   :  { %s715_s0 = smov 64   ;;  %s716_s7 = smov 4  }
  0x22   :  { %32 = dma.hbm_to_vmem [thread:$0]  %s830_s1, 4096, %s740_s15, [#allocation6], %s715_s0, %s715_s0, %s716_s7  }
  0x23   :  { %707 = dma.done.wait [#allocation3], 64  }
  0x24   :  { %708 = vsyncadd [#allocation3], 4294967232 }
  0x25   :  { %709 = dma.done.wait [#allocation6], 4096  }
  0x26   :  { %710 = vsyncadd [#allocation6], 4294963200  ;;  %v717_v0 = vmov 0.0   ;;  %vm718_vm0 = vmmov 0   ;;  %v613_v1 = vld [vmem:[#allocation5] sm:$0xff]   ;;  %v614_v2 = vld [vmem:[#allocation5 + $0x8] sm:$0xff]  }
  0x27   :  { %538 = vmatprep.subr.bf16.mxu0 %v717_v0  ;;  %542 = vmatprep.mubr.msk.bf16.mxu0 %vm718_vm0, %v717_v0  ;;  %v615_v3 = vld [vmem:[#allocation5 + $0x40] sm:$0xff]   ;;  %vm66_vm1 = vcmask 261120   ;;  %v616_v4 = vld [vmem:[#allocation5 + $0x48] sm:$0xff]   ;;  %v42_v5 = vld [vmem:[#allocation2] sm:$0xf]  ;;  %s719_s17 = smov [#allocation7]  }
  0x28   :  { %546 = vmatprep.subr.bf16.mxu1 %v717_v0  ;;  %562 = vmatprep.mubr.msk.bf16.mxu1 %vm718_vm0, %v717_v0  ;;  %v617_v6 = vld [vmem:[#allocation5 + $0x50] sm:$0xff]   ;;  %v618_v7 = vld [vmem:[#allocation5 + $0x58] sm:$0xff]   ;;  %v619_v8 = vld [vmem:[#allocation5 + $0x60] sm:$0xff]   ;;  %s464_s18 = sshll.u32 %s719_s17, 4  ;;  %vm456_vm2 = vcmask 130048   ;;  %s465_s18 = int_to_ptr.vmem [resolvable:$true] %s464_s18 }
  0x29   :  { %539 = vmatpush3.bf16.msra.mxu0 %v613_v1  ;;  %547 = vmatpush3.bf16.msra.mxu1 %v615_v3  ;;  %v620_v9 = vld [vmem:[#allocation5 + $0x68] sm:$0xff]   ;;  %v621_v10 = vld [vmem:[#allocation5 + $0x70] sm:$0xff]   ;;  %v622_v11 = vld [vmem:[#allocation5 + $0x78] sm:$0xff]   ;;  %s685_s19 = scalar_lea.vmem %s465_s18, 128  ;;  %p690_p3 = scmp.lt.s32.totalorder %s465_s18, %s465_s18 }
  0x2a   :  { %540 = vmatprep.subr.bf16.mxu0 %v717_v0  ;;  %548 = vmatprep.subr.bf16.mxu1 %v717_v0  ;;  %v623_v12 = vld [vmem:[#allocation5 + $0x80] sm:$0xff]   ;;  %v624_v13 = vld [vmem:[#allocation5 + $0x88] sm:$0xff]   ;;  %v625_v14 = vld [vmem:[#allocation5 + $0x90] sm:$0xff]   ;;  %p686_p2 = scmp.ne.s32.totalorder %s465_s18, %s685_s19  ;;  %p691_p4 = scmp.lt.s32.totalorder %s685_s19, %s685_s19 }
  0x2b   :  { %v626_v15 = vld [vmem:[#allocation5 + $0x98] sm:$0xff]   ;;  %v627_v16 = vld [vmem:[#allocation5 + $0xa0] sm:$0xff]   ;;  %v628_v17 = vld [vmem:[#allocation5 + $0xa8] sm:$0xff]  }
  0x2c   :  { %v474_v18 = vld [vmem:[%s831_s2] ss:$0 sm:$0xff]  ;;  %v629_v26 = vld [vmem:[#allocation5 + $0xb0] sm:$0xff]   ;;  %v631_v28 = vld [vmem:[#allocation5 + $0xc0] sm:$0xff]   ;;  %p692_p5 = por %p691_p4, %p690_p3 }
  0x2d   :  { %541 = vmatpush3.bf16.msra.mxu0 %v614_v2  ;;  %549 = vmatpush3.bf16.msra.mxu1 %v616_v4  ;;  %v630_v27 = vld [vmem:[#allocation5 + $0xb8] sm:$0xff]   ;;  %v632_v29 = vld [vmem:[#allocation5 + $0xc8] sm:$0xff]   ;;  %v633_v30 = vld [vmem:[#allocation5 + $0xd0] sm:$0xff]  }
  0x2e   :  { %566 = vmatprep.subr.bf16.mxu0 %v717_v0  ;;  %550 = vmatprep.subr.bf16.mxu1 %v717_v0  ;;  %v634_v31 = vld [vmem:[#allocation5 + $0xd8] sm:$0xff]   ;;  %v635_v32 = vld [vmem:[#allocation5 + $0xe0] sm:$0xff]   ;;  %v636_v33 = vld [vmem:[#allocation5 + $0xe8] sm:$0xff]   ;;  %p693_p6 = pnand %p692_p5, %p686_p2 }
  0x2f   :  { %v479_v34 = vld [vmem:[%s831_s2 + $0x1] ss:$0 sm:$0xff]  ;;  %v637_v42 = vld [vmem:[#allocation5 + $0xf0] sm:$0xff]   ;;  %v489_v44 = vld [vmem:[%s831_s2 + $0x2] ss:$0 sm:$0xff] }
  0x30   :  { %543 = vmatmul.mubr.msk.bf16.vlgmr.msra.gmra.mrb[0].mxu0 %vm66_vm1, %v42_v5  ;;  %v638_v43 = vld [vmem:[#allocation5 + $0xf8] sm:$0xff]  }
  0x31   :  { %582 = vmatprep.mubr.msk.bf16.mxu0 %vm718_vm0, %v717_v0  ;;  %551 = vmatpush3.bf16.msra.mxu1 %v617_v6  ;;  %v499_v52 = vld [vmem:[%s831_s2 + $0x3] ss:$0 sm:$0xff] }
  0x32   :  { %552 = vmatprep.subr.bf16.mxu1 %v717_v0  ;;  %567 = vmatpush3.bf16.msra.mxu0 %v623_v12 }
  0x33   :  { %568 = vmatprep.subr.bf16.mxu0 %v717_v0 }
  0x35   :  { %553 = vmatpush3.bf16.msra.mxu1 %v618_v7 }
  0x36   :  { %554 = vmatprep.subr.bf16.mxu1 %v717_v0  ;;  %569 = vmatpush3.bf16.msra.mxu0 %v624_v13 }
  0x37   :  { %570 = vmatprep.subr.bf16.mxu0 %v717_v0 }
  0x39   :  { %555 = vmatpush3.bf16.msra.mxu1 %v619_v8 }
  0x3a   :  { %556 = vmatprep.subr.bf16.mxu1 %v717_v0  ;;  %571 = vmatpush3.bf16.msra.mxu0 %v625_v14 }
  0x3b   :  { %572 = vmatprep.subr.bf16.mxu0 %v717_v0 }
  0x3d   :  { %557 = vmatpush3.bf16.msra.mxu1 %v620_v9 }
  0x3e   :  { %558 = vmatprep.subr.bf16.mxu1 %v717_v0  ;;  %573 = vmatpush3.bf16.msra.mxu0 %v626_v15 }
  0x3f   :  { %574 = vmatprep.subr.bf16.mxu0 %v717_v0 }
  0x41   :  { %559 = vmatpush3.bf16.msra.mxu1 %v621_v10 }
  0x42   :  { %560 = vmatprep.subr.bf16.mxu1 %v717_v0  ;;  %575 = vmatpush3.bf16.msra.mxu0 %v627_v16 }
  0x43   :  { %576 = vmatprep.subr.bf16.mxu0 %v717_v0 }
  0x45   :  { %561 = vmatpush3.bf16.msra.mxu1 %v622_v11 }
  0x46   :  { %586 = vmatprep.subr.bf16.mxu1 %v717_v0  ;;  %577 = vmatpush3.bf16.msra.mxu0 %v628_v17 }
  0x47   :  { %578 = vmatprep.subr.bf16.mxu0 %v717_v0 }
  0x4a   :  { %579 = vmatpush3.bf16.msra.mxu0 %v629_v26 }
  0x4b   :  { %580 = vmatprep.subr.bf16.mxu0 %v717_v0 }
  0x4e   :  { %581 = vmatpush3.bf16.msra.mxu0 %v630_v27 }
 0x103   :  { %v104_v19 = vpop.f32.mrb[0].mxu0 }
 0x104   :  { %v105_v20 = vadd.f32 %v474_v18, %v104_v19  ;;  %v544_v21 = vpop.f32.mrb[1].mxu0 }
 0x105   :  { %v107_v22 = vpop.f32.mrb[2].mxu0 }
 0x106   :  { %v110_v23 = vmax.f32 %v105_v20, 0.0  ;;  %v545_v24 = vpop.f32.mrb[3].mxu0 }
 0x108   :  { %v111_v25 = vpack.c.bf16 %v110_v23, %v110_v23 }
 0x10a   :  { %563 = vmatmul.mubr.bf16.vlgmr.msra.gmra.mrb[0].mxu1 %v111_v25 }
 0x10b   :  { %602 = vmatprep.mubr.msk.bf16.mxu1 %vm718_vm0, %v717_v0  ;;  %587 = vmatpush3.bf16.msra.mxu1 %v631_v28 }
 0x10c   :  { %588 = vmatprep.subr.bf16.mxu1 %v717_v0 }
 0x10f   :  { %589 = vmatpush3.bf16.msra.mxu1 %v632_v29 }
 0x110   :  { %590 = vmatprep.subr.bf16.mxu1 %v717_v0 }
 0x113   :  { %591 = vmatpush3.bf16.msra.mxu1 %v633_v30 }
 0x114   :  { %592 = vmatprep.subr.bf16.mxu1 %v717_v0 }
 0x117   :  { %593 = vmatpush3.bf16.msra.mxu1 %v634_v31 }
 0x118   :  { %594 = vmatprep.subr.bf16.mxu1 %v717_v0 }
 0x11b   :  { %595 = vmatpush3.bf16.msra.mxu1 %v635_v32 }
 0x11c   :  { %596 = vmatprep.subr.bf16.mxu1 %v717_v0 }
 0x11f   :  { %597 = vmatpush3.bf16.msra.mxu1 %v636_v33 }
 0x120   :  { %598 = vmatprep.subr.bf16.mxu1 %v717_v0 }
 0x123   :  { %599 = vmatpush3.bf16.msra.mxu1 %v637_v42 }
 0x124   :  { %600 = vmatprep.subr.bf16.mxu1 %v717_v0 }
 0x127   :  { %601 = vmatpush3.bf16.msra.mxu1 %v638_v43 }
 0x1dd   :  { %v219_v35 = vpop.f32.mrb[0].mxu1 }
 0x1de   :  { %v220_v36 = vadd.f32 %v479_v34, %v219_v35  ;;  %v564_v37 = vpop.f32.mrb[1].mxu1 }
 0x1df   :  { %v222_v38 = vpop.f32.mrb[2].mxu1 }
 0x1e0   :  { %v225_v39 = vmax.f32 %v220_v36, 0.0  ;;  %v565_v40 = vpop.f32.mrb[3].mxu1 }
 0x1e2   :  { %v226_v41 = vpack.c.bf16 %v225_v39, %v225_v39 }
 0x1e4   :  { %583 = vmatmul.mubr.bf16.vlgmr.msra.gmra.mrb[4].mxu0 %v226_v41 }
 0x2b7   :  { %v334_v45 = vpop.f32.mrb[4].mxu0 }
 0x2b8   :  { %v335_v46 = vadd.f32 %v489_v44, %v334_v45  ;;  %v584_v47 = vpop.f32.mrb[5].mxu0 }
 0x2b9   :  { %v337_v48 = vpop.f32.mrb[6].mxu0 }
 0x2ba   :  { %v340_v49 = vmax.f32 %v335_v46, 0.0  ;;  %v585_v50 = vpop.f32.mrb[7].mxu0 }
 0x2bc   :  { %v341_v51 = vpack.c.bf16 %v340_v49, %v340_v49 }
 0x2be   :  { %603 = vmatmul.mubr.bf16.vlgmr.msra.gmra.mrb[4].mxu1 %v341_v51 }
 0x391   :  { %v449_v53 = vpop.f32.mrb[4].mxu1 }
 0x392   :  { %v450_v54 = vadd.f32 %v499_v52, %v449_v53  ;;  %v604_v55 = vpop.f32.mrb[5].mxu1 }
 0x393   :  { %v452_v56 = vpop.f32.mrb[6].mxu1 }
 0x394   :  { %639 = vtanh.f32 %v450_v54  ;;  %v605_v57 = vpop.f32.mrb[7].mxu1 }
 0x39e   :  { %v640_v58 = vpop.eup %639 }
 0x39f   :  { %457 = vst.msk [vmem:[#allocation7] sm:$0xff] %vm456_vm2, %v640_v58 }
 0x3a0   :  { %696 = shalt.err (!%p693_p6)
}
 0x3a1   :  { %s697_s21 = scalar_lea.hbm %s832_s3, 128 }
 0x3a2   :  { %p698_p7 = scmp.ne.s32.totalorder %s832_s3, %s697_s21  ;;  %p701_p8 = scmp.lt.u32.totalorder %s697_s21, %s832_s3 }
 0x3a4   :  { %p703_p9 = pnand %p701_p8, %p698_p7 }
 0x3a6   :  { %706 = shalt.err (!%p703_p9)
}
 0x3a7   :  { %467 = dma.vmem_to_hbm [thread:$0]  %s465_s18, 128, %s832_s3, [#allocation4]  }
 0x3a8   :  { %711 = dma.done.wait [#allocation4], 128  }
 0x3a9   :  { %712 = vsyncadd [#allocation4], 4294967168 }
 0x3aa   :  { %471 = vsyncpa [#allocation3], 1 }
 0x3ab   :  { %472 = vsyncpa [#allocation6], 1 }
 0x3ac   :  { %473 = vsyncpa [#allocation4], 1 }

</bundles_post_ra>
